<compile_context>
chip_gen: v5e
topology: v5e:2x2
jax: 0.10.0
libtpu: 0.0.40
codegen_flags: <defaults>
</compile_context>

<pallas_src>
import functools

import jax
import jax.numpy as jnp
from jax.experimental import pallas as pl
from jax.experimental.pallas import tpu as pltpu


def _vmem_limit_bytes():
    """Per-chip VMEM budget: ~80% of physical, capped at 100 MiB.

    v5e/v6e (128 MiB physical) -> 100 MiB; v7x (64 MiB physical) -> ~51 MiB.
    Falls back to 48 MiB (safe on every generation) if the query fails.
    """
    try:
        cap = pltpu.get_tpu_info().vmem_capacity_bytes
        return min(int(cap * 0.8), 100 * 1024 * 1024)
    except Exception:
        return 48 * 1024 * 1024


def _bf16_exp_ok():
    """v6e/v7x EUP has a bf16 transcendental path (~2x exp rate); v2-v5 do not."""
    try:
        kind = jax.devices()[0].device_kind.lower()
    except Exception:
        return False
    return not any(v in kind for v in ("v2", "v3", "v4", "v5"))


def _pick_tiles(B, N, D, heads, budget_bytes):
    """Choose (block_b, block_q) so the per-step VMEM footprint fits the budget.

    Prefers large q tiles (fewer sequential inner steps / bigger lane-dense
    stores), then large batch blocks, while keeping >= 2 steps on the parallel
    batch axis when B > 1 so megacore / v7x dual-TC sharding has work to split.
    """
    def est(bb, tq):
        bh = bb * heads
        weights = D * D * 4 + 2 * D * D * 2 + 4 * heads * D * 4 + D * 4
        x_in = 2 * bb * N * D * 4                      # double-buffered x block
        kv_scr = bh * N * D * (4 + 2)                  # kb f32 + vb bf16 scratch
        sim_out = 2 * bh * tq * N * 4                  # double-buffered sim block
        out_out = 2 * bb * tq * D * 4                  # double-buffered out block
        live = bh * tq * (4 * D + 4 * N + 2 * N + 4 * D) + bb * N * D * 6
        return weights + x_in + kv_scr + sim_out + out_out + live

    bb_cands = [d for d in range(min(B, 8), 0, -1) if B % d == 0]
    if B > 1:
        bb_cands = [d for d in bb_cands if B // d >= 2] or bb_cands
    tq_cands = [t for t in range(N, 0, -1) if N % t == 0 and t % 8 == 0]
    if not tq_cands:
        tq_cands = [N]
    for tq in tq_cands:
        for bb in bb_cands:
            if est(bb, tq) <= budget_bytes:
                return bb, tq
    return bb_cands[-1], tq_cands[-1]


def _attention_kernel(x_ref, wk_ref, wv_ref, wo_ref, bo_ref, kmask_ref,
                      vmask_ref, out_ref, sim_ref, kb_scr, vb_scr, *,
                      heads, block_q, exp_dtype, flat_sim, flat_out):
    """One grid step = (batch block b, query tile qi).

    x_ref     : (Bblk, N, D) f32      full-sequence input (resident over qi)
    wk_ref    : (D, D) f32            k weight, (in, out) layout
    wv_ref    : (D, D) bf16           v weight, (in, out) layout
    wo_ref    : (D, D) bf16           to_out weight, (in, out) layout
    bo_ref    : (1, D) f32            to_out bias
    kmask_ref : (1, heads, 1, D) f32  per-head lane mask * softmax scale
    vmask_ref : (1, heads, 1, D) bf16 per-head lane mask (1/0)
    out_ref   : (Bblk, tq, D) or (Bblk, tq*D)            projected output tile
    sim_ref   : (Bblk*heads, tq, N) or (Bblk*heads, tq*N) pre-softmax logits
    kb_scr    : VMEM (Bblk*heads, N, D) f32   masked+scaled K (per batch block)
    vb_scr    : VMEM (Bblk*heads, N, D) bf16  masked V (per batch block)
    """
    bblk, n, d = x_ref.shape
    bh = bblk * heads
    qi = pl.program_id(1)

    # --- K/V projection once per batch block.  The q-tile axis is the inner,
    #     sequential ("arbitrary") grid axis, so the scratch stays valid.
    @pl.when(qi == 0)
    def _project_kv():
        x = x_ref[...]                                   # (Bblk, N, D) f32
        xf = x.reshape(bblk * n, d)                      # free view: N % 8 == 0
        # k stays f32 so the returned sim logits match the reference tightly.
        k = jnp.dot(xf, wk_ref[...], preferred_element_type=jnp.float32)
        # v only feeds the (loose-tolerance) output path -> bf16 MXU operands.
        v = jnp.dot(xf.astype(jnp.bfloat16), wv_ref[...],
                    preferred_element_type=jnp.float32)
        kb_scr[...] = (k.reshape(bblk, 1, n, d) *
                       kmask_ref[...]).reshape(bh, n, d)     # scale folded in
        vb_scr[...] = (v.astype(jnp.bfloat16).reshape(bblk, 1, n, d) *
                       vmask_ref[...]).reshape(bh, n, d)

    # --- current query tile: sublane-aligned dynamic slice of the resident x.
    q0 = pl.multiple_of(qi * block_q, block_q)
    xq = x_ref[:, pl.ds(q0, block_q), :]                 # (Bblk, tq, D) f32
    # q is NOT masked: kb already carries the per-head mask and 0/1 masks are
    # idempotent under the contraction, so a plain broadcast suffices.
    qb = jnp.broadcast_to(xq.reshape(bblk, 1, block_q, d),
                          (bblk, heads, block_q, d)).reshape(bh, block_q, d)

    # sim[bh, i, j] = scale * <q_h[i], k_h[j]>   (exact: off-head lanes are 0)
    sim = jax.lax.dot_general(qb, kb_scr[...], (((2,), (2,)), ((0,), (0,))),
                              preferred_element_type=jnp.float32)  # (BH,tq,N)
    if flat_sim:
        sim_ref[...] = sim.reshape(bh, block_q * n)      # lane-dense store
    else:
        sim_ref[...] = sim

    # --- softmax over keys; exp in bf16 on v6e/v7x (EUP-bound at small D),
    #     accumulation / normalization in f32.
    m = jnp.max(sim, axis=-1, keepdims=True)
    p = jnp.exp((sim - m).astype(exp_dtype))
    l = jnp.sum(p.astype(jnp.float32), axis=-1, keepdims=True)
    inv_l = pl.reciprocal(l, approx=True)                # (BH, tq, 1) f32

    # attn @ v in bf16 (f32 accumulation).  Each head's contribution lands only
    # in its own lane slice (vb is masked), so the head sum recombines
    # 'b h n d -> b n (h d)' with no concatenation.
    oh = jax.lax.dot_general(p.astype(jnp.bfloat16), vb_scr[...],
                             (((2,), (1,)), ((0,), (0,))),
                             preferred_element_type=jnp.float32)   # (BH,tq,D)
    oh = oh * inv_l                                      # per-(head,row) norm
    o = jnp.sum(oh.reshape(bblk, heads, block_q, d), axis=1)       # (Bblk,tq,D)

    # to_out: o @ Wo^T + b   (bf16 MXU operands, f32 accumulate)
    out = jnp.dot(o.reshape(bblk * block_q, d).astype(jnp.bfloat16), wo_ref[...],
                  preferred_element_type=jnp.float32) + bo_ref[...]
    if flat_out:
        out_ref[...] = out.reshape(bblk, block_q * d)
    else:
        out_ref[...] = out.reshape(bblk, block_q, d)


def attention_forward(x, w_kv, w_out, b_out, heads, block_b=None, block_q=None):
    """x: (B, N, D) float32. Returns (out (B, N, D), sim (B*heads, N, N))."""
    B, N, D = x.shape
    assert D % heads == 0, "query_dim must be divisible by heads"
    assert N % 8 == 0, "sequence length must be a multiple of 8 (pad first)"
    # TODO(synk): for D > 128 (dim_head >= 128) the lane-mask formulation does
    # heads x extra MXU work / VMEM; switch to a true per-head layout
    # (heads folded into the dot_general batch dim, last dim = dim_head) there.
    dh = D // heads
    scale = float(D) ** -0.5            # PyTorch quirk: query_dim ** -0.5

    vmem_limit = _vmem_limit_bytes()
    if block_b is None or block_q is None:
        bb, tq = _pick_tiles(B, N, D, heads, int(0.6 * vmem_limit))
        block_b = bb if block_b is None else block_b
        block_q = tq if block_q is None else block_q
    assert B % block_b == 0 and N % block_q == 0 and block_q % 8 == 0
    grid = (B // block_b, N // block_q)

    # Host-side (one-time) weight prep: (in, out) layout, kv split; bf16 for
    # the loose-tolerance output path, f32 for the sim path.
    w_k_t = jnp.transpose(w_kv[:D]).astype(jnp.float32)     # (D, D)
    w_v_t = jnp.transpose(w_kv[D:]).astype(jnp.bfloat16)    # (D, D)
    w_o_t = jnp.transpose(w_out).astype(jnp.bfloat16)       # (D, D)
    b_o = b_out.reshape(1, D).astype(jnp.float32)

    # Per-head lane masks (heads, D) -> (1, heads, 1, D); softmax scale folded
    # into the k mask so no extra VPU multiply is needed in the kernel.
    head_id = jnp.arange(D, dtype=jnp.int32) // dh
    sel = (head_id[None, :] ==
           jnp.arange(heads, dtype=jnp.int32)[:, None]).astype(jnp.float32)
    kmask = (sel * scale).reshape(1, heads, 1, D)
    vmask = sel.reshape(1, heads, 1, D).astype(jnp.bfloat16)

    # Lane-dense output slabs when the natural last dim is lane-sparse (<128)
    # and the flattened block still satisfies the (8,128)/full-dim rule.
    flat_sim = ((N % 128 != 0)
                and ((block_q * N) % 128 == 0 or block_q == N)
                and ((block_b * heads) % 8 == 0 or block_b == B))
    flat_out = ((D % 128 != 0)
                and ((block_q * D) % 128 == 0 or block_q == N)
                and (block_b % 8 == 0 or block_b == B))

    exp_dtype = jnp.bfloat16 if _bf16_exp_ok() else jnp.float32

    if flat_sim:
        sim_shape = jax.ShapeDtypeStruct((B * heads, N * N), jnp.float32)
        sim_spec = pl.BlockSpec((block_b * heads, block_q * N),
                                lambda b, q: (b, q))
    else:
        sim_shape = jax.ShapeDtypeStruct((B * heads, N, N), jnp.float32)
        sim_spec = pl.BlockSpec((block_b * heads, block_q, N),
                                lambda b, q: (b, q, 0))
    if flat_out:
        out_shape = jax.ShapeDtypeStruct((B, N * D), jnp.float32)
        out_spec = pl.BlockSpec((block_b, block_q * D), lambda b, q: (b, q))
    else:
        out_shape = jax.ShapeDtypeStruct((B, N, D), jnp.float32)
        out_spec = pl.BlockSpec((block_b, block_q, D), lambda b, q: (b, q, 0))

    kernel = functools.partial(_attention_kernel, heads=heads, block_q=block_q,
                               exp_dtype=exp_dtype,
                               flat_sim=flat_sim, flat_out=flat_out)

    out, sim = pl.pallas_call(
        kernel,
        out_shape=(out_shape, sim_shape),
        grid=grid,
        in_specs=[
            pl.BlockSpec((block_b, N, D), lambda b, q: (b, 0, 0)),      # x
            pl.BlockSpec((D, D), lambda b, q: (0, 0)),                  # Wk^T
            pl.BlockSpec((D, D), lambda b, q: (0, 0)),                  # Wv^T
            pl.BlockSpec((D, D), lambda b, q: (0, 0)),                  # Wo^T
            pl.BlockSpec((1, D), lambda b, q: (0, 0)),                  # b_out
            pl.BlockSpec((1, heads, 1, D), lambda b, q: (0, 0, 0, 0)),  # kmask
            pl.BlockSpec((1, heads, 1, D), lambda b, q: (0, 0, 0, 0)),  # vmask
        ],
        out_specs=(out_spec, sim_spec),
        scratch_shapes=[
            pltpu.VMEM((block_b * heads, N, D), jnp.float32),   # masked K*scale
            pltpu.VMEM((block_b * heads, N, D), jnp.bfloat16),  # masked V
        ],
        compiler_params=pltpu.CompilerParams(
            dimension_semantics=("parallel", "arbitrary"),
            vmem_limit_bytes=vmem_limit,
        ),
    )(x, w_k_t, w_v_t, w_o_t, b_o, kmask, vmask)

    if flat_out:
        out = out.reshape(B, N, D)          # contiguous -> metadata-only
    if flat_sim:
        sim = sim.reshape(B * heads, N, N)  # contiguous -> metadata-only
    return out, sim


def _reference(x, w_kv, w_out, b_out, heads):
    """Pure-JAX reference mirroring the PyTorch forward."""
    B, N, D = x.shape
    dh = D // heads
    scale = float(D) ** -0.5
    kv = jnp.einsum('bnd,ed->bne', x, w_kv)           # (B, N, 2D)
    k, v = kv[..., :D], kv[..., D:]
    q = x

    def split(t):  # 'b n (h d) -> (b h) n d'
        return t.reshape(B, N, heads, dh).transpose(0, 2, 1, 3).reshape(
            B * heads, N, dh)

    q, k, v = map(split, (q, k, v))
    sim = jnp.einsum('bid,bjd->bij', q, k) * scale
    attn = jax.nn.softmax(sim, axis=-1)
    o = jnp.einsum('bij,bjd->bid', attn, v)
    o = o.reshape(B, heads, N, dh).transpose(0, 2, 1, 3).reshape(B, N, D)
    out = jnp.einsum('bnd,ed->bne', o, w_out) + b_out
    return out, sim


if __name__ == "__main__":
    B, N, D, HEADS = 2, 8, 32, 8          # query_dim=32, heads=8 -> dim_head=4

    key = jax.random.PRNGKey(0)
    kx, kkv, kwo, kbo = jax.random.split(key, 4)

    x = jax.random.normal(kx, (B, N, D), dtype=jnp.float32)
    # deterministic synthetic weights (PyTorch Linear layout: (out, in))
    w_kv = 0.05 * jax.random.normal(kkv, (2 * D, D), dtype=jnp.float32)
    w_out = 0.05 * jax.random.normal(kwo, (D, D), dtype=jnp.float32)
    b_out = 0.05 * jax.random.normal(kbo, (D,), dtype=jnp.float32)
    # TODO(synk): to_q, to_v and Dropout exist in __init__ but are unused in
    # the PyTorch forward; intentionally omitted.

    out, sim = attention_forward(x, w_kv, w_out, b_out, HEADS)
    jax.block_until_ready((out, sim))

    out_ref, sim_ref = _reference(x, w_kv, w_out, b_out, HEADS)
    assert out.shape == (B, N, D) and sim.shape == (B * HEADS, N, N)
    # sim logits are computed fully in f32 -> tight tolerance.
    assert jnp.allclose(sim, sim_ref, atol=1e-5, rtol=1e-5), \
        float(jnp.max(jnp.abs(sim - sim_ref)))
    # out path intentionally uses bf16 MXU operands, (possibly) bf16 exp and
    # the EUP approximate reciprocal -> loose tolerance (typical err ~1e-3).
    assert jnp.allclose(out, out_ref, atol=1e-2, rtol=1e-2), \
        float(jnp.max(jnp.abs(out - out_ref)))

    print("KERNEL_OK")
</pallas_src>

<mosaic_0001>
module attributes {stable_mosaic.version = 11 : i64} {
  func.func @_attention_kernel(%arg0: i32, %arg1: i32, %arg2: memref<1x8x32xf32, #tpu.memory_space<vmem>>, %arg3: memref<32x32xf32, #tpu.memory_space<vmem>>, %arg4: memref<32x32xbf16, #tpu.memory_space<vmem>>, %arg5: memref<32x32xbf16, #tpu.memory_space<vmem>>, %arg6: memref<1x32xf32, #tpu.memory_space<vmem>>, %arg7: memref<1x8x1x32xf32, #tpu.memory_space<vmem>>, %arg8: memref<1x8x1x32xbf16, #tpu.memory_space<vmem>>, %arg9: memref<1x8x32xf32, #tpu.memory_space<vmem>>, %arg10: memref<8x64xf32, #tpu.memory_space<vmem>>, %arg11: memref<8x8x32xf32, #tpu.memory_space<vmem>>, %arg12: memref<8x8x32xbf16, #tpu.memory_space<vmem>>) attributes {dimension_semantics = [#tpu.dimension_semantics<parallel>, #tpu.dimension_semantics<arbitrary>], iteration_bounds = array<i64: 2, 1>, scalar_prefetch = 0 : i64, scratch_operands = 2 : i64, tpu.core_type = #tpu.core_type<tc>, window_params = [{transform_indices = @transform_0, window_bounds = array<i64: 1, 8, 32>}, {pipeline_mode = #tpu.pipeline_mode<synchronous>, transform_indices = @transform_1, window_bounds = array<i64: 32, 32>}, {pipeline_mode = #tpu.pipeline_mode<synchronous>, transform_indices = @transform_2, window_bounds = array<i64: 32, 32>}, {pipeline_mode = #tpu.pipeline_mode<synchronous>, transform_indices = @transform_3, window_bounds = array<i64: 32, 32>}, {pipeline_mode = #tpu.pipeline_mode<synchronous>, transform_indices = @transform_4, window_bounds = array<i64: 1, 32>}, {pipeline_mode = #tpu.pipeline_mode<synchronous>, transform_indices = @transform_5, window_bounds = array<i64: 1, 8, 1, 32>}, {pipeline_mode = #tpu.pipeline_mode<synchronous>, transform_indices = @transform_6, window_bounds = array<i64: 1, 8, 1, 32>}, {transform_indices = @transform_7, window_bounds = array<i64: 1, 8, 32>}, {transform_indices = @transform_8, window_bounds = array<i64: 8, 64>}]} {
    %c0_i32 = arith.constant 0 : i32
    %0 = arith.cmpi eq, %arg1, %c0_i32 : i32
    %1 = arith.extui %0 : i1 to i32
    %c0_i32_0 = arith.constant 0 : i32
    %2 = arith.cmpi ne, %1, %c0_i32_0 : i32
    scf.if %2 {
      %c0_22 = arith.constant 0 : index
      %c0_23 = arith.constant 0 : index
      %c0_24 = arith.constant 0 : index
      %40 = vector.load %arg2[%c0_22, %c0_23, %c0_24] : memref<1x8x32xf32, #tpu.memory_space<vmem>>, vector<1x8x32xf32>
      %41 = vector.shape_cast %40 : vector<1x8x32xf32> to vector<8x32xf32>
      %c0_25 = arith.constant 0 : index
      %c0_26 = arith.constant 0 : index
      %42 = vector.load %arg3[%c0_25, %c0_26] : memref<32x32xf32, #tpu.memory_space<vmem>>, vector<32x32xf32>
      %cst_27 = arith.constant dense<0.000000e+00> : vector<8x32xf32>
      %43 = tpu.matmul %41, %42, %cst_27 {dimension_numbers = #tpu.dot_dimension_numbers<[1], [0], [0], [1], [0, 0, 1, 1], [], []>} : vector<8x32xf32>, vector<32x32xf32>, vector<8x32xf32> -> vector<8x32xf32>
      %44 = arith.truncf %41 : vector<8x32xf32> to vector<8x32xbf16>
      %c0_28 = arith.constant 0 : index
      %c0_29 = arith.constant 0 : index
      %45 = vector.load %arg4[%c0_28, %c0_29] : memref<32x32xbf16, #tpu.memory_space<vmem>>, vector<32x32xbf16>
      %cst_30 = arith.constant dense<0.000000e+00> : vector<8x32xf32>
      %46 = tpu.matmul %44, %45, %cst_30 {dimension_numbers = #tpu.dot_dimension_numbers<[1], [0], [0], [1], [0, 0, 1, 1], [], []>} : vector<8x32xbf16>, vector<32x32xbf16>, vector<8x32xf32> -> vector<8x32xf32>
      %47 = vector.shape_cast %43 : vector<8x32xf32> to vector<1x1x8x32xf32>
      %c0_31 = arith.constant 0 : index
      %c0_32 = arith.constant 0 : index
      %c0_33 = arith.constant 0 : index
      %c0_34 = arith.constant 0 : index
      %48 = vector.load %arg7[%c0_31, %c0_32, %c0_33, %c0_34] : memref<1x8x1x32xf32, #tpu.memory_space<vmem>>, vector<1x8x1x32xf32>
      %49 = vector.broadcast %47 : vector<1x1x8x32xf32> to vector<1x8x8x32xf32>
      %50 = vector.broadcast %48 : vector<1x8x1x32xf32> to vector<1x8x8x32xf32>
      %51 = arith.mulf %49, %50 : vector<1x8x8x32xf32>
      %52 = vector.shape_cast %51 : vector<1x8x8x32xf32> to vector<8x8x32xf32>
      %c0_35 = arith.constant 0 : index
      %c0_36 = arith.constant 0 : index
      %c0_37 = arith.constant 0 : index
      %53 = vector.load %arg11[%c0_35, %c0_36, %c0_37] : memref<8x8x32xf32, #tpu.memory_space<vmem>>, vector<8x8x32xf32>
      tpu.vector_store %arg11[%c0_35, %c0_36, %c0_37], %52 {strides = array<i32>} : memref<8x8x32xf32, #tpu.memory_space<vmem>>, vector<8x8x32xf32>,
      %54 = arith.truncf %46 : vector<8x32xf32> to vector<8x32xbf16>
      %55 = vector.shape_cast %54 : vector<8x32xbf16> to vector<1x1x8x32xbf16>
      %c0_38 = arith.constant 0 : index
      %c0_39 = arith.constant 0 : index
      %c0_40 = arith.constant 0 : index
      %c0_41 = arith.constant 0 : index
      %56 = vector.load %arg8[%c0_38, %c0_39, %c0_40, %c0_41] : memref<1x8x1x32xbf16, #tpu.memory_space<vmem>>, vector<1x8x1x32xbf16>
      %57 = vector.broadcast %55 : vector<1x1x8x32xbf16> to vector<1x8x8x32xbf16>
      %58 = vector.broadcast %56 : vector<1x8x1x32xbf16> to vector<1x8x8x32xbf16>
      %59 = arith.mulf %57, %58 : vector<1x8x8x32xbf16>
      %60 = vector.shape_cast %59 : vector<1x8x8x32xbf16> to vector<8x8x32xbf16>
      %c0_42 = arith.constant 0 : index
      %c0_43 = arith.constant 0 : index
      %c0_44 = arith.constant 0 : index
      %61 = vector.load %arg12[%c0_42, %c0_43, %c0_44] : memref<8x8x32xbf16, #tpu.memory_space<vmem>>, vector<8x8x32xbf16>
      tpu.vector_store %arg12[%c0_42, %c0_43, %c0_44], %60 {strides = array<i32>} : memref<8x8x32xbf16, #tpu.memory_space<vmem>>, vector<8x8x32xbf16>,
    } else {
    }
    %c8_i32 = arith.constant 8 : i32
    %3 = arith.muli %arg1, %c8_i32 : i32
    %4 = tpu.assume_multiple %3, 8 : i32
    %c0 = arith.constant 0 : index
    %5 = arith.index_cast %4 : i32 to index
    %c0_1 = arith.constant 0 : index
    %6 = vector.load %arg2[%c0, %5, %c0_1] : memref<1x8x32xf32, #tpu.memory_space<vmem>>, vector<1x8x32xf32>
    %7 = vector.shape_cast %6 : vector<1x8x32xf32> to vector<1x1x8x32xf32>
    %8 = vector.shape_cast %7 : vector<1x1x8x32xf32> to vector<1x1x8x32xf32>
    %9 = vector.broadcast %8 : vector<1x1x8x32xf32> to vector<1x8x8x32xf32>
    %10 = vector.shape_cast %9 : vector<1x8x8x32xf32> to vector<8x8x32xf32>
    %c0_2 = arith.constant 0 : index
    %c0_3 = arith.constant 0 : index
    %c0_4 = arith.constant 0 : index
    %11 = vector.load %arg11[%c0_2, %c0_3, %c0_4] : memref<8x8x32xf32, #tpu.memory_space<vmem>>, vector<8x8x32xf32>
    %cst = arith.constant dense<0.000000e+00> : vector<8x8x8xf32>
    %12 = tpu.matmul %10, %11, %cst {dimension_numbers = #tpu.dot_dimension_numbers<[2], [2], [1], [1], [0, 0, 0, 1, 1, 1], [0], [0]>} : vector<8x8x32xf32>, vector<8x8x32xf32>, vector<8x8x8xf32> -> vector<8x8x8xf32>
    %13 = vector.shape_cast %12 : vector<8x8x8xf32> to vector<8x64xf32>
    %c0_5 = arith.constant 0 : index
    %c0_6 = arith.constant 0 : index
    %14 = vector.load %arg10[%c0_5, %c0_6] : memref<8x64xf32, #tpu.memory_space<vmem>>, vector<8x64xf32>
    tpu.vector_store %arg10[%c0_5, %c0_6], %13 {strides = array<i32>} : memref<8x64xf32, #tpu.memory_space<vmem>>, vector<8x64xf32>,
    %cst_7 = arith.constant dense<0xFF800000> : vector<8x8xf32>
    %15 = vector.multi_reduction <maximumf>, %12, %cst_7 [2] : vector<8x8x8xf32> to vector<8x8xf32>
    %16 = vector.shape_cast %15 : vector<8x8xf32> to vector<8x8x1xf32>
    %17 = vector.broadcast %16 : vector<8x8x1xf32> to vector<8x8x8xf32>
    %18 = arith.subf %12, %17 : vector<8x8x8xf32>
    %19 = arith.truncf %18 : vector<8x8x8xf32> to vector<8x8x8xbf16>
    %20 = math.exp %19 : vector<8x8x8xbf16>
    %21 = arith.extf %20 : vector<8x8x8xbf16> to vector<8x8x8xf32>
    %cst_8 = arith.constant dense<0.000000e+00> : vector<8x8xf32>
    %22 = vector.multi_reduction <add>, %21, %cst_8 [2] : vector<8x8x8xf32> to vector<8x8xf32>
    %23 = vector.shape_cast %22 : vector<8x8xf32> to vector<8x8x1xf32>
    %24 = tpu.reciprocal %23 {approx = true} : vector<8x8x1xf32> -> vector<8x8x1xf32>
    %c0_9 = arith.constant 0 : index
    %c0_10 = arith.constant 0 : index
    %c0_11 = arith.constant 0 : index
    %25 = vector.load %arg12[%c0_9, %c0_10, %c0_11] : memref<8x8x32xbf16, #tpu.memory_space<vmem>>, vector<8x8x32xbf16>
    %cst_12 = arith.constant dense<0.000000e+00> : vector<8x8x32xf32>
    %26 = tpu.matmul %20, %25, %cst_12 {dimension_numbers = #tpu.dot_dimension_numbers<[2], [1], [1], [2], [0, 0, 0, 1, 1, 2], [0], [0]>} : vector<8x8x8xbf16>, vector<8x8x32xbf16>, vector<8x8x32xf32> -> vector<8x8x32xf32>
    %27 = vector.broadcast %24 : vector<8x8x1xf32> to vector<8x8x32xf32>
    %28 = arith.mulf %26, %27 : vector<8x8x32xf32>
    %29 = vector.shape_cast %28 : vector<8x8x32xf32> to vector<1x8x8x32xf32>
    %cst_13 = arith.constant dense<0.000000e+00> : vector<1x8x32xf32>
    %30 = vector.multi_reduction <add>, %29, %cst_13 [1] : vector<1x8x8x32xf32> to vector<1x8x32xf32>
    %31 = vector.shape_cast %30 : vector<1x8x32xf32> to vector<8x32xf32>
    %32 = arith.truncf %31 : vector<8x32xf32> to vector<8x32xbf16>
    %c0_14 = arith.constant 0 : index
    %c0_15 = arith.constant 0 : index
    %33 = vector.load %arg5[%c0_14, %c0_15] : memref<32x32xbf16, #tpu.memory_space<vmem>>, vector<32x32xbf16>
    %cst_16 = arith.constant dense<0.000000e+00> : vector<8x32xf32>
    %34 = tpu.matmul %32, %33, %cst_16 {dimension_numbers = #tpu.dot_dimension_numbers<[1], [0], [0], [1], [0, 0, 1, 1], [], []>} : vector<8x32xbf16>, vector<32x32xbf16>, vector<8x32xf32> -> vector<8x32xf32>
    %c0_17 = arith.constant 0 : index
    %c0_18 = arith.constant 0 : index
    %35 = vector.load %arg6[%c0_17, %c0_18] : memref<1x32xf32, #tpu.memory_space<vmem>>, vector<1x32xf32>
    %36 = vector.broadcast %35 : vector<1x32xf32> to vector<8x32xf32>
    %37 = arith.addf %34, %36 : vector<8x32xf32>
    %38 = vector.shape_cast %37 : vector<8x32xf32> to vector<1x8x32xf32>
    %c0_19 = arith.constant 0 : index
    %c0_20 = arith.constant 0 : index
    %c0_21 = arith.constant 0 : index
    %39 = vector.load %arg9[%c0_19, %c0_20, %c0_21] : memref<1x8x32xf32, #tpu.memory_space<vmem>>, vector<1x8x32xf32>
    tpu.vector_store %arg9[%c0_19, %c0_20, %c0_21], %38 {strides = array<i32>} : memref<1x8x32xf32, #tpu.memory_space<vmem>>, vector<1x8x32xf32>,
    return
  }
  func.func @transform_0(%arg0: i32, %arg1: i32) -> (i32, i32, i32) {
    %c0_i32 = arith.constant 0 : i32
    %c0_i32_0 = arith.constant 0 : i32
    %c0_i32_1 = arith.constant 0 : i32
    return %arg0, %c0_i32, %c0_i32_0 : i32, i32, i32
  }
  func.func @transform_1(%arg0: i32, %arg1: i32) -> (i32, i32) {
    %c0_i32 = arith.constant 0 : i32
    %c0_i32_0 = arith.constant 0 : i32
    %c0_i32_1 = arith.constant 0 : i32
    return %c0_i32, %c0_i32_0 : i32, i32
  }
  func.func @transform_2(%arg0: i32, %arg1: i32) -> (i32, i32) {
    %c0_i32 = arith.constant 0 : i32
    %c0_i32_0 = arith.constant 0 : i32
    %c0_i32_1 = arith.constant 0 : i32
    return %c0_i32, %c0_i32_0 : i32, i32
  }
  func.func @transform_3(%arg0: i32, %arg1: i32) -> (i32, i32) {
    %c0_i32 = arith.constant 0 : i32
    %c0_i32_0 = arith.constant 0 : i32
    %c0_i32_1 = arith.constant 0 : i32
    return %c0_i32, %c0_i32_0 : i32, i32
  }
  func.func @transform_4(%arg0: i32, %arg1: i32) -> (i32, i32) {
    %c0_i32 = arith.constant 0 : i32
    %c0_i32_0 = arith.constant 0 : i32
    %c0_i32_1 = arith.constant 0 : i32
    return %c0_i32, %c0_i32_0 : i32, i32
  }
  func.func @transform_5(%arg0: i32, %arg1: i32) -> (i32, i32, i32, i32) {
    %c0_i32 = arith.constant 0 : i32
    %c0_i32_0 = arith.constant 0 : i32
    %c0_i32_1 = arith.constant 0 : i32
    %c0_i32_2 = arith.constant 0 : i32
    %c0_i32_3 = arith.constant 0 : i32
    return %c0_i32, %c0_i32_0, %c0_i32_1, %c0_i32_2 : i32, i32, i32, i32
  }
  func.func @transform_6(%arg0: i32, %arg1: i32) -> (i32, i32, i32, i32) {
    %c0_i32 = arith.constant 0 : i32
    %c0_i32_0 = arith.constant 0 : i32
    %c0_i32_1 = arith.constant 0 : i32
    %c0_i32_2 = arith.constant 0 : i32
    %c0_i32_3 = arith.constant 0 : i32
    return %c0_i32, %c0_i32_0, %c0_i32_1, %c0_i32_2 : i32, i32, i32, i32
  }
  func.func @transform_7(%arg0: i32, %arg1: i32) -> (i32, i32, i32) {
    %c0_i32 = arith.constant 0 : i32
    %c0_i32_0 = arith.constant 0 : i32
    return %arg0, %arg1, %c0_i32 : i32, i32, i32
  }
  func.func @transform_8(%arg0: i32, %arg1: i32) -> (i32, i32) {
    %c0_i32 = arith.constant 0 : i32
    return %arg0, %arg1 : i32, i32
  }
}

</mosaic_0001>

<bundles_post_ra>
// kernel: tpu_custom_call.1
= control target key start
LH: loop header
LB: loop body
LE: loop exit
PB: predicated region body
PF: predicated region fallthrough
CT: control target
= control target key end

     0   :  { %s2416_s0 = inlined_call_operand.hbm [shape: f32[2,8,32], index: 0, kind: input, shape index: {}]   ;;  %s2417_s1 = inlined_call_operand.hbm [shape: f32[32,32], index: 1, kind: input, shape index: {}]   ;;  %s2418_s2 = inlined_call_operand.hbm [shape: bf16[32,32], index: 2, kind: input, shape index: {}]   ;;  %s2419_s3 = inlined_call_operand.hbm [shape: bf16[32,32], index: 3, kind: input, shape index: {}]   ;;  %s2420_s4 = inlined_call_operand.vmem [shape: f32[1,32], index: 4, kind: input, shape index: {}]   ;;  %s2421_s5 = inlined_call_operand.vmem [shape: f32[1,8,1,32], index: 5, kind: input, shape index: {}]   ;;  %s2422_s6 = inlined_call_operand.vmem [shape: bf16[1,8,1,32], index: 6, kind: input, shape index: {}]   ;;  %s2423_s7 = inlined_call_operand.hbm [shape: f32[2,8,32], index: 7, kind: output, shape index: {0}]   ;;  %s2424_s8 = inlined_call_operand.hbm [shape: f32[16,64], index: 8, kind: output, shape index: {1}]  }
   0x1   :  { %2425 = sst [smem:[#allocation20_spill]] %s2416_s0 }
   0x2   :  { %2426 = sst [smem:[#allocation21_spill]] %s2417_s1 }
   0x3   :  { %2427 = sst [smem:[#allocation22_spill]] %s2418_s2 }
   0x4   :  { %2428 = sst [smem:[#allocation23_spill]] %s2419_s3 }
   0x5   :  { %14 = vsyncpa [#allocation5], 0 }
   0x6   :  { %16 = vsyncpa [#allocation5 + $0x1], 0 }
   0x7   :  { %17 = vsyncpa [#allocation8], 0 }
   0x8   :  { %18 = vsyncpa [#allocation11], 0 }
   0x9   :  { %19 = vsyncpa [#allocation6], 0 }
   0xa   :  { %21 = vsyncpa [#allocation6 + $0x1], 0 }
   0xb   :  { %22 = vsyncpa [#allocation14], 0 }
   0xc   :  { %24 = vsyncpa [#allocation14 + $0x1], 0  ;;  %s1986_s27 = smov 0   ;;  %s1988_s28 = smov 0  }
   0xd   :  { %s1990_s29 = smov 0   ;;  %s1992_s30 = smov 0  }
   0xe   :  { %s1994_s9 = smov 0   ;;  %s1996_s10 = smov 0  }
   0xf LB: > { %s1460_s11 = sadd.s32 4294967295, %s1923_s10   ;;  %p1462_p0 = scmp.ge.s32.totalorder %s1923_s10, 1  ;;  %s1923_s10 = sphi %s1996_s10, %s30_s10   ;;  %s1919_s9 = sphi %s1994_s9, %s2444_s9   ;;  %s1915_s30 = sphi %s1992_s30, %s2443_s30   ;;  %s1911_s29 = sphi %s1990_s29, %s2442_s29   ;;  %s1907_s28 = sphi %s1988_s28, %s2441_s28   ;;  %s1903_s27 = sphi %s1986_s27, %s2440_s27  }
  0x10   : > { %p2020_p1 = scmp.eq.s32.totalorder %s1460_s11, 0  ;;  %p255_p2 = scmp.lt.s32.totalorder %s1923_s10, 3 }
  0x11   : > { %s2430_s1 = sld [smem:[#allocation21_spill]]  ;;  %s1925_s17 = smov [#allocation7]  }
  0x12   : > { %p2028_p3 = pnand %p1462_p0, %p255_p2  ;;  %s268_s18 = sshll.u32 %s1925_s17, 4  ;;  %s269_s18 = int_to_ptr.vmem [resolvable:$true] %s268_s18 }
  0x13   : > { %p1466_p6 = scmp.ge.s32.totalorder %s1923_s10, 2  ;;  %s2433_s2 = sld [smem:[#allocation22_spill]] }
  0x14   : > { %p1547_p4 = pneg %p2028_p3  ;;  %s1926_s23 = smov 128  }
  0x15   : > { %s1927_s24 = smov 8   ;;  %s1928_s25 = smov [#allocation9]  }
  0x16   : > { %p2036_p5 = pnand %p1547_p4, %p2020_p1  ;;  %s282_s26 = sshll.u32 %s1928_s25, 4  ;;  %s283_s26 = int_to_ptr.vmem [resolvable:$true] %s282_s26 }
  0x17   : > { %s266_s15 = sshll.u32 %s2430_s1, 4  ;;  %s1929_s13 = smov 64   ;;  %s267_s15 = int_to_ptr.hbm [resolvable:$true] %s266_s15 }
  0x18   : > { %1550 = dma.hbm_to_vmem [thread:$0]  (!%p2036_p5), %s267_s15, 512, %s269_s18, [#allocation8], %s1926_s23, %s1926_s23, %s1927_s24  }
  0x19   : > { %s280_s22 = sshll.u32 %s2433_s2, 4  ;;  %s1930_s14 = smov 4   ;;  %s281_s22 = int_to_ptr.hbm [resolvable:$true] %s280_s22 }
  0x1a   : > { %1553 = dma.hbm_to_vmem [thread:$0]  (!%p2036_p5), %s281_s22, 256, %s283_s26, [#allocation8], %s1929_s13, %s1929_s13, %s1930_s14  }
  0x1b   : > { %s2434_s3 = sld [smem:[#allocation23_spill]]  ;;  %s1931_s15 = smov [#allocation10]  }
  0x1c   : > { %s296_s18 = sshll.u32 %s1931_s15, 4  ;;  %s1461_s23 = sadd.s32 4294967294, %s1923_s10   ;;  %s297_s18 = int_to_ptr.vmem [resolvable:$true] %s296_s18 }
  0x1d   : > { %s42_s24 = sadd.s32 1, %s1919_s9  ;;  %s49_s25 = sadd.s32 1, %s1911_s29 }
  0x1e   : > { %p44_p7 = scmp.ge.s32.totalorder %s42_s24, 2  ;;  %p56_p8 = scmp.ne.s32.totalorder %s1911_s29, %s1907_s28 }
  0x1f   : > { %p57_p9 = scmp.eq.s32.totalorder %s1923_s10, 0  ;;  %p62_p10 = scmp.ne.s32.totalorder %s1907_s28, %s1903_s27 }
  0x20   : > { %s2446_s24 = smov (%p44_p7, %s42_s24), 0  ;;  %p214_p13 = scmp.eq.s32.totalorder %s1460_s11, 1 }
  0x21   : > { %s294_s21 = sshll.u32 %s2434_s3, 4  ;;  %p2063_p11 = por %p57_p9, %p56_p8  ;;  %s295_s21 = int_to_ptr.hbm [resolvable:$true] %s294_s21 }
  0x22   : > { %1556 = dma.hbm_to_vmem [thread:$0]  (!%p2036_p5), %s295_s21, 256, %s297_s18, [#allocation11], %s1929_s13, %s1929_s13, %s1930_s14  }
  0x23   : > { %p2069_p12 = por %p2020_p1, %p62_p10  ;;  %s46_s26 = ssub.s32 %s1919_s9, %s2446_s24 }
  0x24   : > { %p47_p0 = scmp.eq.s32.totalorder %s46_s26, 0  ;;  %p220_p2 = scmp.eq.s32.totalorder %s1461_s23, 1 }
  0x25   : > { %p2077_p4 = por %p214_p13, %p56_p8  ;;  %p1571_p5 = scmp.lt.s32.totalorder %s1923_s10, 2 }
  0x26   : > { %s2083_s14 = scalar_select %p47_p0, %s1911_s29, %s49_s25  }
  0x27   : > { %p2085_p7 = por %p220_p2, %p62_p10  ;;  %s319_s20 = sand.u32 1, %s1911_s29  }
  0x28   : > { %s1467_s21 = sshll.u32 %s319_s20, 3  ;;  %s1468_s15 = sshll.u32 %s1919_s9, 3 }
  0x29   : > { %s2439_s0 = sld [smem:[#allocation20_spill]]  ;;  %s323_s26 = scalar_lea.vmem [#allocation4], %s1467_s21 }
  0x2a   : > { %s331_s23 = sshll.u32 %s323_s26, 4  ;;  %p1558_p8 = pnand %p1571_p5, %p2063_p11  ;;  %s332_s23 = int_to_ptr.vmem [resolvable:$true] %s331_s23 }
  0x2b   : > { %s320_s25 = scalar_lea.sflag [#allocation5], %s319_s20  ;;  %s2099_s3 = sand.u32 (!%p2028_p3), 1, %s1907_s28  }
  0x2c   : > { %s2102_s1 = sshll.u32 (!%p2028_p3), %s2099_s3, 3  ;;  %s343_s21 = scalar_lea.sflag (!%p2028_p3), [#allocation5], %s2099_s3 }
  0x2d   : > { %340 = sbr.rel (%p2028_p3) target bundleno = 771 (0x303), region = 48 }
  0x2f   : > { %s327_s11 = scalar_lea.hbm %s2439_s0, %s1468_s15  ;;  %s346_s15 = scalar_lea.vmem (!%p2028_p3), [#allocation4], %s2102_s1 }
  0x30   : > { %s329_s2 = sshll.u32 %s327_s11, 4  ;;  %s330_s2 = int_to_ptr.hbm [resolvable:$true] %s329_s2 }
  0x31   : > { %1560 = dma.hbm_to_vmem [thread:$0]  (!%p1558_p8), %s330_s2, 128, %s332_s23, %s320_s25  }
  0x32   : > { %1882 = dma.done.wait (%p2069_p12), %s343_s21, 128  }
  0x33   : > { %1884 = vsyncadd (%p2069_p12), %s343_s21, 4294967168 }
  0x34   : > { %1886 = dma.done.wait (%p2020_p1), [#allocation8], 768  }
  0x35   : > { %1888 = vsyncadd (%p2020_p1), [#allocation8], 4294966528 }
  0x36   : > { %1890 = dma.done.wait (%p2020_p1), [#allocation11], 256  }
  0x37   : > { %1892 = vsyncadd (%p2020_p1), [#allocation11], 4294967040  ;;  %v409_v0 = vld [vmem:[#allocation7 + $0x18] sm:$0xff]  ;;  %v408_v1 = vld [vmem:[#allocation7 + $0x10] sm:$0xff]  ;;  %vm410_vm0 = vcmask 261120   ;;  %vm930_vm1 = vcmask 64512  }
  0x38   : > { %426 = vmatpush.msra.mxu0 %v409_v0  ;;  %v407_v2 = vld [vmem:[#allocation7 + $0x8] sm:$0xff]  ;;  %v406_v3 = vld [vmem:[#allocation7] sm:$0xff]  ;;  %v405_v4 = vld [vmem:[%s346_s15] sm:$0xff]  ;;  %v1932_v41 = vmov 1983009808   ;;  %vm790_vm2 = vcmask 1047556  }
  0x39   : > { %v1640_v5 = vld [vmem:[%s2421_s5] ss:$0 sm:$0xff]  ;;  %v1641_v6 = vld [vmem:[%s2421_s5 + $0x1] ss:$0 sm:$0xff]  ;;  %v1642_v7 = vld [vmem:[%s2421_s5 + $0x2] ss:$0 sm:$0xff]  ;;  %v434_v21 = vpack.c.bf16 %v405_v4, %v405_v4  ;;  %v795_v42 = vunpack.c.l.s4 %v1932_v41 }
  0x3a   : > { %427 = vmatpush.msra.mxu0 %v408_v1  ;;  %v1643_v8 = vld [vmem:[%s2421_s5 + $0x3] ss:$0 sm:$0xff]  ;;  %v1644_v9 = vld [vmem:[%s2421_s5 + $0x4] ss:$0 sm:$0xff]  ;;  %v1526_v10 = vld [vmem:[#allocation9 + $0x8] sm:$0xff]  ;;  %vm581_vm3 = vcmask 257024  }
  0x3b   : > { %v1645_v12 = vld [vmem:[%s2421_s5 + $0x5] ss:$0 sm:$0xff]  ;;  %v1646_v13 = vld [vmem:[%s2421_s5 + $0x6] ss:$0 sm:$0xff]  ;;  %460 = vmatpush.bf16.msra.mxu1 %v1526_v10  ;;  %v1525_v17 = vld [vmem:[#allocation9] sm:$0xff]  ;;  %v2193_v49 = vunpack.c.0.s8 %v795_v42  ;;  %vm1068_vm4 = vcmask 1043456  }
  0x3c   : > { %428 = vmatpush.msra.mxu0 %v407_v2  ;;  %v1647_v18 = vld [vmem:[%s2421_s5 + $0x7] ss:$0 sm:$0xff]  ;;  %v1933_v62 = vmov 1934713408   ;;  %s1934_s18 = smov 8   ;;  %s1935_s11 = smov 24  }
  0x3d   : > { %v843_v63 = vunpack.c.l.s4 %v1933_v62  ;;  %s1936_s26 = smov 16   ;;  %s1937_s23 = smov 40   ;;  %vm932_vm5 = vcmask 130048   ;;  %vm934_vm6 = vcmask 195584   ;;  %vm937_vm7 = vcmask 326656  }
  0x3e   : > { %429 = vmatpush.msra.mxu0 %v406_v3  ;;  %s1938_s25 = smov 48   ;;  %s1939_s21 = smov 32   ;;  %vm939_vm8 = vcmask 392192   ;;  %vm941_vm9 = vcmask 457728   ;;  %vm943_vm10 = vcmask 523264  }
  0x3f   : > { %1476 = vmatmul.msk.f32.vlgmr.msra.gmra.mxu0 %vm410_vm0, %v405_v4  ;;  %461 = vmatpush.bf16.msra.mxu1 %v1525_v17  ;;  %s1940_s15 = smov 56   ;;  %s1521_s2 = sshll.u32 %s1915_s30, 3 }
  0x40   : > { %s399_s16 = scalar_lea.vmem [#allocation13], %s2102_s1  ;;  %s1311_s12 = scalar_lea.hbm %s2424_s8, %s1521_s2 }
  0x41   : > { %s1313_s20 = sshll.u32 %s399_s16, 4  ;;  %s1314_s20 = int_to_ptr.vmem [resolvable:$true] %s1313_s20 }
  0x42   : > { %1485 = vmatmul.msk.bf16.vlgmr.msra.gmra.mxu1 %vm410_vm0, %v434_v21 }
  0xbc   : > { %v431_v11 = vpop.f32.mrf.mxu0 }
  0xbd   : > { %v499_v14 = vmul.f32 %v1640_v5, %v431_v11  ;;  %v500_v15 = vmul.f32 %v1641_v6, %v431_v11  ;;  %v501_v16 = vmul.f32 %v1642_v7, %v431_v11  ;;  %v502_v19 = vmul.f32 %v1643_v8, %v431_v11 }
  0xbe   : > { %v503_v20 = vmul.f32 %v1644_v9, %v431_v11  ;;  %v504_v22 = vmul.f32 %v1645_v12, %v431_v11  ;;  %v505_v23 = vmul.f32 %v1646_v13, %v431_v11  ;;  %v506_v24 = vmul.f32 %v1647_v18, %v431_v11  ;;  %v516_v13 = vld [vmem:[%s2422_s6] sm:$0x1]  ;;  %v520_v18 = vld [vmem:[%s2422_s6 + $0x4] sm:$0x1] }
  0xbf   : > { %507 = vst.msk [vmem:[#allocation2] sm:$0xff] %vm410_vm0, %v499_v14  ;;  %v2168_v33 = vpop.f32.mrf.mxu1  ;;  %v2228_v5 = vunpack.c.0.s8 %v843_v63  ;;  %v517_v14 = vld [vmem:[%s2422_s6 + $0x1] sm:$0x1]  ;;  %v525_v17 = vpack.i.b16 %v516_v13, %v516_v13 }
  0xc0   : > { %508 = vst.msk [vmem:[#allocation2 + $0x8] sm:$0xff] %vm410_vm0, %v500_v15  ;;  %v518_v15 = vld [vmem:[%s2422_s6 + $0x2] sm:$0x1] }
  0xc1   : > { %509 = vst.msk [vmem:[#allocation2 + $0x10] sm:$0xff] %vm410_vm0, %v501_v16  ;;  %v519_v16 = vld [vmem:[%s2422_s6 + $0x3] sm:$0x1]  ;;  %v533_v21 = vpack.i.b16 %v518_v15, %v518_v15 }
  0xc2   : > { %510 = vst.msk [vmem:[#allocation2 + $0x18] sm:$0xff] %vm410_vm0, %v502_v19  ;;  %v529_v19 = vpack.i.b16 %v517_v14, %v517_v14 }
  0xc3   : > { %511 = vst.msk [vmem:[#allocation2 + $0x20] sm:$0xff] %vm410_vm0, %v503_v20  ;;  %v521_v20 = vld [vmem:[%s2422_s6 + $0x5] sm:$0x1] }
  0xc4   : > { %512 = vst.msk [vmem:[#allocation2 + $0x28] sm:$0xff] %vm410_vm0, %v504_v22  ;;  %v522_v22 = vld [vmem:[%s2422_s6 + $0x6] sm:$0x1] }
  0xc5   : > { %513 = vst.msk [vmem:[#allocation2 + $0x30] sm:$0xff] %vm410_vm0, %v505_v23  ;;  %v537_v23 = vpack.i.b16 %v519_v16, %v519_v16 }
  0xc6   : > { %514 = vst.msk [vmem:[#allocation2 + $0x38] sm:$0xff] %vm410_vm0, %v506_v24  ;;  %v593_v25 = vld [vmem:[#allocation2] sm:$0xff]  ;;  %v515_v24 = vpack.c.bf16 %v2168_v33, %v2168_v33 }
  0xc7   : > { %1486 = vmatpush.xpose.msk.msra.mxu2 %vm410_vm0, %v593_v25  ;;  %v594_v26 = vld [vmem:[#allocation2 + $0x8] sm:$0xff]  ;;  %v465_v39 = vpop.f32.mrf.mxu1  ;;  %v523_v25 = vld [vmem:[%s2422_s6 + $0x7] sm:$0x1] }
  0xc8   : > { %1488 = vmatpush.xpose.msk.msra.mxu3 %vm410_vm0, %v594_v26  ;;  %v595_v27 = vld [vmem:[#allocation2 + $0x10] sm:$0xff]  ;;  %v527_v26 = vperm.slane %v525_v17, 0  ;;  %v556_v39 = vunpack.c.l.bf16 %v515_v24 }
  0xc9   : > { %v596_v28 = vld [vmem:[#allocation2 + $0x18] sm:$0xff] }
  0xca   : > { %v597_v29 = vld [vmem:[#allocation2 + $0x20] sm:$0xff]  ;;  %1487 = vmatmul.msk.f32.vlgmr.msra.gmra.mxu2 %vm410_vm0, %v405_v4  ;;  %v557_v41 = vunpack.c.l.bf16 %v527_v26 }
  0xcb   : > { %1490 = vmatpush.xpose.msk.msrb.mxu2 %vm410_vm0, %v595_v27  ;;  %1494 = vmatpush.xpose.msk.msrb.mxu0 %vm410_vm0, %v597_v29  ;;  %v598_v30 = vld [vmem:[#allocation2 + $0x28] sm:$0xff]  ;;  %v541_v27 = vpack.i.b16 %v520_v18, %v520_v18  ;;  %v545_v29 = vpack.i.b16 %v521_v20, %v521_v20 }
  0xcc   : > { %1492 = vmatpush.xpose.msk.msrb.mxu3 %vm410_vm0, %v596_v28  ;;  %v599_v31 = vld [vmem:[#allocation2 + $0x30] sm:$0xff]  ;;  %v531_v28 = vperm.slane %v529_v19, 0 }
  0xcd   : > { %1489 = vmatmul.msk.f32.vlgmr.msra.gmra.mxu3 %vm410_vm0, %v405_v4  ;;  %v600_v32 = vld [vmem:[#allocation2 + $0x38] sm:$0xff]  ;;  %v547_v42 = vperm.slane %v545_v29, 0 }
  0xce   : > { %1495 = vmatmul.msk.f32.vlgmr.msrb.gmra.mxu0 %vm410_vm0, %v405_v4 }
  0xcf   : > { %1496 = vmatpush.xpose.msk.msra.mxu2 %vm410_vm0, %v598_v30  ;;  %1500 = vmatpush.xpose.msk.msra.mxu0 %vm410_vm0, %v600_v32  ;;  %v535_v30 = vperm.slane %v533_v21, 0  ;;  %v539_v32 = vperm.slane %v537_v23, 0 }
  0xd0   : > { %1498 = vmatpush.xpose.msk.msra.mxu3 %vm410_vm0, %v599_v31  ;;  %v549_v31 = vpack.i.b16 %v522_v22, %v522_v22 }
  0xd2   : > { %1491 = vmatmul.msk.f32.vlgmr.msrb.gmra.mxu2 %vm410_vm0, %v405_v4 }
  0xd5   : > { %1493 = vmatmul.msk.f32.vlgmr.msrb.gmra.mxu3 %vm410_vm0, %v405_v4 }
  0xd6   : > { %1501 = vmatmul.msk.f32.vlgmr.msra.gmra.mxu0 %vm410_vm0, %v405_v4 }
  0xda   : > { %1497 = vmatmul.msk.f32.vlgmr.msra.gmra.mxu2 %vm410_vm0, %v405_v4 }
  0xdd   : > { %1499 = vmatmul.msk.f32.vlgmr.msra.gmra.mxu3 %vm410_vm0, %v405_v4 }
 0x14b   : > { %v2172_v35 = vpop.f32.mrf.mxu0 }
 0x14c   : > { %v957_v55 = vsel %vm930_vm1, %v2172_v35, -inf }
 0x14d   : > { %v2170_v34 = vpop.f32.mrf.mxu2 }
 0x14e   : > { %v945_v37 = vsel %vm930_vm1, %v2170_v34, -inf }
 0x14f   : > { %946 = vmax.xlane.f32.xlu1 %v945_v37  ;;  %v553_v37 = vpack.i.b16 %v523_v25, %v523_v25 }
 0x150   : > { %v2174_v36 = vpop.f32.mrf.mxu3 }
 0x151   : > { %v948_v38 = vsel %vm930_vm1, %v2174_v36, -inf  ;;  %v555_v33 = vperm.slane %v553_v37, 0 }
 0x152   : > { %949 = vmax.xlane.f32.xlu0 %v948_v38  ;;  %v543_v38 = vperm.slane %v541_v27, 0 }
 0x153   : > { %v2189_v47 = vpop.f32.mrf.mxu0 }
 0x154   : > { %v826_v50 = vrot.slane %v2189_v47, 4  ;;  %v966_v54 = vsel %vm930_vm1, %v2189_v47, -inf }
 0x155   : > { %v2180_v40 = vpop.f32.mrf.mxu2 }
 0x156   : > { %v951_v44 = vsel %vm930_vm1, %v2180_v40, -inf  ;;  %v789_v51 = vrot.slane %v2180_v40, 4 }
 0x158   : > { %v2182_v43 = vpop.f32.mrf.mxu3  ;;  %v791_v59 = vsel %vm790_vm2, %v789_v51, %v2170_v34  ;;  %v565_v51 = vmul.f32 %v557_v41, %v556_v39 }
 0x159   : > { %v802_v45 = vrot.slane %v2182_v43, 4  ;;  %v954_v46 = vsel %vm930_vm1, %v2182_v43, -inf  ;;  %v2223_v3 = vperm.slane %v791_v59, %v2193_v49  ;;  %v564_v59 = vunpack.c.l.bf16 %v555_v33 }
 0x15a   : > { %955 = vmax.xlane.f32.xlu1 %v954_v46  ;;  %952 = vmax.xlane.f32.xlu0 %v951_v44  ;;  %v558_v44 = vunpack.c.l.bf16 %v531_v28  ;;  %v559_v46 = vunpack.c.l.bf16 %v535_v30  ;;  %v573_v63 = vpack.c.bf16 %v565_v51, %v565_v51 }
 0x15b   : > { %v803_v48 = vsel %vm790_vm2, %v802_v45, %v2174_v36  ;;  %v551_v45 = vperm.slane %v549_v31, 0 }
 0x15c   : > { %v2198_v52 = vperm.slane %v803_v48, %v2193_v49  ;;  %v560_v48 = vunpack.c.l.bf16 %v539_v32  ;;  %582 = vst.msk [vmem:[#allocation3] sm:$0xf] %vm581_vm3, %v573_v63 }
 0x15d   : > { %v2200_v53 = vpop.f32.mrf.mxu2 }
 0x15e   : > { %v827_v56 = vsel %vm790_vm2, %v826_v50, %v2200_v53  ;;  %v960_v58 = vsel %vm930_vm1, %v2200_v53, -inf  ;;  %v838_v0 = vrot.slane %v2198_v52, 4  ;;  %v561_v50 = vunpack.c.l.bf16 %v543_v38 }
 0x15f   : > { %v2215_v60 = vperm.slane %v827_v56, %v2193_v49  ;;  %961 = vmax.xlane.f32.xlu2 %v960_v58  ;;  %v563_v56 = vunpack.c.l.bf16 %v551_v45  ;;  %v567_v58 = vmul.f32 %v559_v46, %v556_v39 }
 0x160   : > { %v2208_v57 = vpop.f32.mrf.mxu3  ;;  %v839_v7 = vsel %vm790_vm2, %v838_v0, %v2223_v3  ;;  %v569_v62 = vmul.f32 %v561_v50, %v556_v39 }
 0x161   : > { %v814_v61 = vrot.slane %v2208_v57, 4  ;;  %v862_v1 = vrot.slane %v2215_v60, 4  ;;  %v963_v6 = vsel %vm930_vm1, %v2208_v57, -inf  ;;  %v2240_v10 = vperm.slane %v839_v7, %v2228_v5 }
 0x162   : > { %967 = vmax.xlane.f32.xlu1 %v966_v54  ;;  %958 = vmax.xlane.f32.xlu0 %v957_v55  ;;  %v562_v54 = vunpack.c.l.bf16 %v547_v42  ;;  %v566_v55 = vmul.f32 %v558_v44, %v556_v39  ;;  %v572_v7 = vmul.f32 %v564_v59, %v556_v39 }
 0x163   : > { %v815_v2 = vsel %vm790_vm2, %v814_v61, %v2172_v35  ;;  %v568_v61 = vmul.f32 %v560_v48, %v556_v39  ;;  %v1057_v16 = vld [vmem:[#allocation3] sm:$0xf] }
 0x164   : > { %v2226_v4 = vperm.slane %v815_v2, %v2193_v49  ;;  %v570_v0 = vmul.f32 %v562_v54, %v556_v39  ;;  %v571_v2 = vmul.f32 %v563_v56, %v556_v39  ;;  %v580_v15 = vpack.c.bf16 %v572_v7, %v572_v7 }
 0x165   : > { %v1070_v17 = vsel %vm1068_vm4, %v1057_v16, 0 }
 0x166   : > { %v863_v8 = vsel %vm790_vm2, %v862_v1, %v2226_v4  ;;  %v574_v1 = vpack.c.bf16 %v566_v55, %v566_v55  ;;  %v578_v13 = vpack.c.bf16 %v570_v0, %v570_v0  ;;  %v579_v14 = vpack.c.bf16 %v571_v2, %v571_v2  ;;  %589 = vst.msk [vmem:[#allocation3 + $0x1c] sm:$0xf] %vm581_vm3, %v580_v15 }
 0x167   : > { %v2237_v9 = vperm.slane %v863_v8, %v2228_v5  ;;  %964 = vmax.xlane.f32.xlu2 %v963_v6  ;;  %v575_v6 = vpack.c.bf16 %v567_v58, %v567_v58  ;;  %v576_v8 = vpack.c.bf16 %v568_v61, %v568_v61  ;;  %1079 = vmatpush.bf16.msrb.mxu1 %v1070_v17 }
 0x168   : > { %583 = vst.msk [vmem:[#allocation3 + $0x4] sm:$0xf] %vm581_vm3, %v574_v1 }
 0x169   : > { %v886_v11 = vrot.slane %v2237_v9, 4  ;;  %584 = vst.msk [vmem:[#allocation3 + $0x8] sm:$0xf] %vm581_vm3, %v575_v6 }
 0x16a   : > { %585 = vst.msk [vmem:[#allocation3 + $0xc] sm:$0xf] %vm581_vm3, %v576_v8 }
 0x16b   : > { %v2245_v12 = vsel %vm790_vm2, %v886_v11, %v2240_v10  ;;  %v577_v11 = vpack.c.bf16 %v569_v62, %v569_v62  ;;  %587 = vst.msk [vmem:[#allocation3 + $0x14] sm:$0xf] %vm581_vm3, %v578_v13 }
 0x16c   : > { %588 = vst.msk [vmem:[#allocation3 + $0x18] sm:$0xf] %vm581_vm3, %v579_v14 }
 0x16d   : > { %586 = vst.msk [vmem:[#allocation3 + $0x10] sm:$0xf] %vm581_vm3, %v577_v11  ;;  %v1064_v29 = vld [vmem:[#allocation3 + $0x1c] sm:$0xf] }
 0x16e   : > { %v1203_v31 = vsel %vm1068_vm4, %v1064_v29, 0 }
 0x16f   : > { %v1058_v18 = vld [vmem:[#allocation3 + $0x4] sm:$0xf] }
 0x170   : > { %v1089_v19 = vsel %vm1068_vm4, %v1058_v18, 0  ;;  %v1059_v20 = vld [vmem:[#allocation3 + $0x8] sm:$0xf] }
 0x171   : > { %1098 = vmatpush.bf16.msrb.mxu2 %v1089_v19  ;;  %v1060_v21 = vld [vmem:[#allocation3 + $0xc] sm:$0xf]  ;;  %v1108_v22 = vsel %vm1068_vm4, %v1059_v20, 0 }
 0x172   : > { %v1127_v23 = vsel %vm1068_vm4, %v1060_v21, 0  ;;  %v1062_v25 = vld [vmem:[#allocation3 + $0x14] sm:$0xf]  ;;  %1117 = vmatpush.bf16.msrb.mxu3 %v1108_v22 }
 0x173   : > { %1136 = vmatpush.bf16.msrb.mxu0 %v1127_v23  ;;  %v1165_v27 = vsel %vm1068_vm4, %v1062_v25, 0  ;;  %v1063_v28 = vld [vmem:[#allocation3 + $0x18] sm:$0xf] }
 0x174   : > { %v1061_v24 = vld [vmem:[#allocation3 + $0x10] sm:$0xf]  ;;  %v1184_v30 = vsel %vm1068_vm4, %v1063_v28, 0 }
 0x175   : > { %v1146_v26 = vsel %vm1068_vm4, %v1061_v24, 0  ;;  %1174 = vmatpush.bf16.msra.mxu2 %v1165_v27 }
 0x176   : > { %1155 = vmatpush.bf16.msra.mxu1 %v1146_v26  ;;  %1193 = vmatpush.bf16.msra.mxu3 %v1184_v30 }
 0x177   : > { %1212 = vmatpush.bf16.msra.mxu0 %v1203_v31 }
 0x1c2   : > { %v947_v32 = vpop.xlane.xlu1 %946 }
 0x1c3   : > { %v969_v38 = vsub.f32 %v2170_v34, %v947_v32 }
 0x1c5   : > { %v950_v37 = vpop.xlane.xlu0 %949  ;;  %v977_v41 = vpack.c.bf16 %v969_v38, %v969_v38 }
 0x1c6   : > { %v970_v39 = vsub.f32 %v2174_v36, %v950_v37 }
 0x1c7   : > { %v985_v44 = vunpack.c.l.bf16 %v977_v41 }
 0x1c8   : > { %v978_v42 = vpack.c.bf16 %v970_v39, %v970_v39 }
 0x1c9   : > { %v993_v46 = vmul.f32 1.442695, %v985_v44 }
 0x1ca   : > { %v986_v45 = vunpack.c.l.bf16 %v978_v42 }
 0x1cb   : > { %1649 = vpow2.f32 %v993_v46 }
 0x1cc   : > { %v995_v33 = vmul.f32 1.442695, %v986_v45 }
 0x1cd   : > { %v956_v48 = vpop.xlane.xlu1 %955  ;;  %v953_v50 = vpop.xlane.xlu0 %952 }
 0x1ce   : > { %1651 = vpow2.f32 %v995_v33  ;;  %v972_v51 = vsub.f32 %v2182_v43, %v956_v48  ;;  %v971_v54 = vsub.f32 %v2180_v40, %v953_v50 }
 0x1d0   : > { %v980_v55 = vpack.c.bf16 %v972_v51, %v972_v51  ;;  %v979_v56 = vpack.c.bf16 %v971_v54, %v971_v54 }
 0x1d1   : > { %v1650_v61 = vpop.eup %1649 }
 0x1d2   : > { %v988_v58 = vunpack.c.l.bf16 %v980_v55  ;;  %v987_v59 = vunpack.c.l.bf16 %v979_v56  ;;  %v1009_v63 = vpack.c.bf16 %v1650_v61, %v1650_v61  ;;  %v962_v2 = vpop.xlane.xlu2 %961 }
 0x1d3   : > { %v974_v11 = vsub.f32 %v2200_v53, %v962_v2 }
 0x1d4   : > { %v1652_v62 = vpop.eup %1651  ;;  %v999_v0 = vmul.f32 1.442695, %v988_v58  ;;  %v997_v1 = vmul.f32 1.442695, %v987_v59  ;;  %1502 = vmatmul.msk.bf16.vlgmr.msrb.gmra.mxu1 %vm930_vm1, %v1009_v63  ;;  %v1017_v15 = vunpack.c.l.bf16 %v1009_v63 }
 0x1d5   : > { %v1010_v6 = vpack.c.bf16 %v1652_v62, %v1652_v62  ;;  %v968_v7 = vpop.xlane.xlu1 %967  ;;  %v959_v8 = vpop.xlane.xlu0 %958  ;;  %v982_v16 = vpack.c.bf16 %v974_v11, %v974_v11  ;;  %v828_v11 = vrot.slane %v2200_v53, 4 }
 0x1d6   : > { %1653 = vpow2.f32 %v999_v0  ;;  %v976_v13 = vsub.f32 %v2189_v47, %v968_v7  ;;  %v973_v14 = vsub.f32 %v2172_v35, %v959_v8  ;;  %v1025_v20 = vsel %vm930_vm1, %v1017_v15, 0.0 }
 0x1d7   : > { %1655 = vpow2.f32 %v997_v1  ;;  %1503 = vmatmul.msk.bf16.vlgmr.msrb.gmra.mxu2 %vm930_vm1, %v1010_v6  ;;  %v1018_v17 = vunpack.c.l.bf16 %v1010_v6  ;;  %v990_v21 = vunpack.c.l.bf16 %v982_v16  ;;  %1026 = vadd.xlane.f32.xlu2 %v1025_v20  ;;  %v816_v7 = vrot.slane %v2172_v35, 4 }
 0x1d8   : > { %v984_v18 = vpack.c.bf16 %v976_v13, %v976_v13  ;;  %v981_v19 = vpack.c.bf16 %v973_v14, %v973_v14  ;;  %v804_v8 = vrot.slane %v2174_v36, 4  ;;  %v840_v15 = vrot.slane %v2223_v3, 4 }
 0x1d9   : > { %v1028_v22 = vsel %vm930_vm1, %v1018_v17, 0.0  ;;  %v1003_v25 = vmul.f32 1.442695, %v990_v21  ;;  %v817_v14 = vsel %vm790_vm2, %v2208_v57, %v816_v7  ;;  %v829_v16 = vsel %vm790_vm2, %v2189_v47, %v828_v11 }
 0x1da   : > { %v992_v23 = vunpack.c.l.bf16 %v984_v18  ;;  %v989_v24 = vunpack.c.l.bf16 %v981_v19  ;;  %1029 = vadd.xlane.f32.xlu0 %v1028_v22  ;;  %v965_v28 = vpop.xlane.xlu2 %964  ;;  %v805_v13 = vsel %vm790_vm2, %v2182_v43, %v804_v8  ;;  %v864_v17 = vrot.slane %v2226_v4, 4 }
 0x1db   : > { %1657 = vpow2.f32 %v1003_v25  ;;  %v975_v32 = vsub.f32 %v2208_v57, %v965_v28  ;;  %v813_v18 = vperm.slane %v805_v13, %v2193_v49  ;;  %v792_v35 = vrot.slane %v2170_v34, 4 }
 0x1dc   : > { %v1654_v26 = vpop.eup %1653  ;;  %v1001_v27 = vmul.f32 1.442695, %v989_v24  ;;  %v1007_v31 = vmul.f32 1.442695, %v992_v23  ;;  %v825_v36 = vperm.slane %v817_v14, %v2193_v49  ;;  %v837_v53 = vperm.slane %v829_v16, %v2193_v49 }
 0x1dd   : > { %v1656_v29 = vpop.eup %1655  ;;  %v1012_v30 = vpack.c.bf16 %v1654_v26, %v1654_v26  ;;  %v983_v38 = vpack.c.bf16 %v975_v32, %v975_v32  ;;  %v793_v43 = vsel %vm790_vm2, %v2180_v40, %v792_v35  ;;  %v841_v57 = vsel %vm790_vm2, %v2198_v52, %v840_v15 }
 0x1de   : > { %v1011_v37 = vpack.c.bf16 %v1656_v29, %v1656_v29  ;;  %1659 = vpow2.f32 %v1001_v27  ;;  %v865_v3 = vsel %vm790_vm2, %v2215_v60, %v864_v17  ;;  %v850_v47 = vrot.slane %v813_v18, 4 }
 0x1df   : > { %1505 = vmatmul.msk.bf16.vlgmr.msrb.gmra.mxu0 %vm930_vm1, %v1012_v30  ;;  %v1020_v39 = vunpack.c.l.bf16 %v1012_v30  ;;  %1661 = vpow2.f32 %v1007_v31  ;;  %v991_v42 = vunpack.c.l.bf16 %v983_v38  ;;  %v876_v19 = vrot.slane %v825_v36, 4 }
 0x1e0   : > { %1504 = vmatmul.msk.bf16.vlgmr.msrb.gmra.mxu3 %vm930_vm1, %v1011_v37  ;;  %v1019_v41 = vunpack.c.l.bf16 %v1011_v37  ;;  %v801_v4 = vperm.slane %v793_v43, %v2193_v49  ;;  %v849_v20 = vperm.slane %v841_v57, %v2228_v5  ;;  %v873_v34 = vperm.slane %v865_v3, %v2228_v5 }
 0x1e1   : > { %v1034_v44 = vsel %vm930_vm1, %v1020_v39, 0.0  ;;  %v1658_v46 = vpop.eup %1657  ;;  %v1005_v33 = vmul.f32 1.442695, %v991_v42  ;;  %v874_v21 = vrot.slane %v837_v53, 4  ;;  %v888_v22 = vrot.slane %v2240_v10, 4 }
 0x1e2   : > { %v1031_v45 = vsel %vm930_vm1, %v1019_v41, 0.0  ;;  %1035 = vadd.xlane.f32.xlu2 %v1034_v44  ;;  %v1014_v48 = vpack.c.bf16 %v1658_v46, %v1658_v46  ;;  %v851_v23 = vsel %vm790_vm2, %v850_v47, %v801_v4  ;;  %v877_v52 = vsel %vm790_vm2, %v837_v53, %v876_v19 }
 0x1e3   : > { %1032 = vadd.xlane.f32.xlu1 %v1031_v45  ;;  %1663 = vpow2.f32 %v1005_v33  ;;  %v889_v40 = vsel %vm790_vm2, %v2237_v9, %v888_v22  ;;  %v892_v60 = vrot.slane %v849_v20, 4  ;;  %v890_v24 = vrot.slane %v873_v34, 4  ;;  %v1528_v45 = vld [vmem:[#allocation10 + $0x8] sm:$0xff] }
 0x1e4   : > { %v1660_v50 = vpop.eup %1659  ;;  %v1022_v54 = vunpack.c.l.bf16 %v1014_v48  ;;  %v875_v49 = vsel %vm790_vm2, %v874_v21, %v825_v36  ;;  %v852_v25 = vrot.slane %v801_v4, 4  ;;  %v857_v26 = vperm.slane %v851_v23, %v2228_v5  ;;  %1271 = vmatpush.bf16.msrb.mxu1 %v1528_v45 }
 0x1e5   : > { %v1013_v51 = vpack.c.bf16 %v1660_v50, %v1660_v50  ;;  %v1662_v55 = vpop.eup %1661  ;;  %v893_v27 = vsel %vm790_vm2, %v873_v34, %v892_v60  ;;  %v885_v10 = vperm.slane %v877_v52, %v2228_v5  ;;  %v881_v28 = vperm.slane %v875_v49, %v2228_v5 }
 0x1e6   : > { %v1040_v58 = vsel %vm930_vm1, %v1022_v54, 0.0  ;;  %v1016_v59 = vpack.c.bf16 %v1662_v55, %v1662_v55  ;;  %v891_v9 = vsel %vm790_vm2, %v890_v24, %v849_v20  ;;  %v896_v29 = vrot.slane %v857_v26, 4  ;;  %v1527_v54 = vld [vmem:[#allocation10] sm:$0xff] }
 0x1e7   : > { %1507 = vmatmul.msk.bf16.vlgmr.msra.gmra.mxu2 %vm930_vm1, %v1014_v48  ;;  %1506 = vmatmul.msk.bf16.vlgmr.msra.gmra.mxu1 %vm930_vm1, %v1013_v51  ;;  %v1021_v56 = vunpack.c.l.bf16 %v1013_v51  ;;  %v853_v30 = vsel %vm790_vm2, %v813_v18, %v852_v25  ;;  %v898_v31 = vrot.slane %v885_v10, 4  ;;  %v894_v38 = vrot.slane %v881_v28, 4 }
 0x1e8   : > { %v1024_v0 = vunpack.c.l.bf16 %v1016_v59  ;;  %v897_v32 = vsel %vm790_vm2, %v881_v28, %v896_v29  ;;  %v861_v37 = vperm.slane %v853_v30, %v2228_v5  ;;  %1272 = vmatpush.bf16.msrb.mxu1 %v1527_v54 }
 0x1e9   : > { %v1037_v61 = vsel %vm930_vm1, %v1021_v56, 0.0  ;;  %v1664_v62 = vpop.eup %1663  ;;  %v895_v41 = vsel %vm790_vm2, %v894_v38, %v857_v26 }
 0x1ea   : > { %1038 = vadd.xlane.f32.xlu0 %v1037_v61  ;;  %v1015_v63 = vpack.c.bf16 %v1664_v62, %v1664_v62  ;;  %v1046_v6 = vsel %vm930_vm1, %v1024_v0, 0.0  ;;  %v899_v39 = vsel %vm790_vm2, %v898_v31, %v861_v37  ;;  %v900_v42 = vrot.slane %v861_v37, 4 }
 0x1eb   : > { %1041 = vadd.xlane.f32.xlu1 %v1040_v58 }
 0x1ec   : > { %v1023_v1 = vunpack.c.l.bf16 %v1015_v63  ;;  %v901_v44 = vsel %vm790_vm2, %v885_v10, %v900_v42 }
 0x1ee   : > { %v1043_v2 = vsel %vm930_vm1, %v1023_v1, 0.0 }
 0x1ef   : > { %1509 = vmatmul.msk.bf16.vlgmr.msra.gmra.mxu0 %vm930_vm1, %v1016_v59  ;;  %1044 = vadd.xlane.f32.xlu2 %v1043_v2 }
 0x1f0   : > { %1508 = vmatmul.msk.bf16.vlgmr.msra.gmra.mxu3 %vm930_vm1, %v1015_v63 }
 0x1f2   : > { %1047 = vadd.xlane.f32.xlu0 %v1046_v6 }
 0x204   : > { %903 = vrot.lane.b32.xlu1 %v889_v40, %s1934_s18  ;;  %s1315_s18 = sshll.u32 %s1311_s12, 4  ;;  %s1316_s18 = int_to_ptr.hbm [resolvable:$true] %s1315_s18 }
 0x206   : > { %911 = vrot.lane.b32.xlu0 %v893_v27, %s1935_s11  ;;  %s1285_s11 = scalar_lea.sflag [#allocation14], %s2099_s3 }
 0x207   : > { %907 = vrot.lane.b32.xlu2 %v891_v9, %s1936_s26  ;;  %s1815_s26 = sshra.s32 %s1316_s18, 4  ;;  %s1816_s26 = int_to_ptr.hbm [resolvable:$true] %s1815_s26 }
 0x208   : > { %p1822_p10 = scmp.lt.s32.totalorder %s1816_s26, %s2424_s8 }
 0x20c   : > { %919 = vrot.lane.b32.xlu1 %v897_v32, %s1937_s23  ;;  %s1817_s23 = scalar_lea.hbm %s1816_s26, 8 }
 0x20d   : > { %p1818_p1 = scmp.ne.s32.totalorder %s1816_s26, %s1817_s23 }
 0x20e   : > { %923 = vrot.lane.b32.xlu0 %v899_v39, %s1938_s25 }
 0x20f   : > { %915 = vrot.lane.b32.xlu2 %v895_v41, %s1939_s21  ;;  %p1819_p3 = pnand %p1818_p1, %p2077_p4  ;;  %s1821_s21 = scalar_lea.hbm %s2424_s8, 16 }
 0x210   : > { %p1823_p11 = scmp.lt.s32.totalorder %s1821_s21, %s1817_s23 }
 0x211   : > { %p1820_p9 = pneg %p1819_p3 }
 0x212   : > { %p1824_p12 = por %p1823_p11, %p1822_p10 }
 0x214   : > { %p1825_p13 = pnand %p1824_p12, %p1820_p9 }
 0x217   : > { %927 = vrot.lane.b32.xlu2 %v901_v44, %s1940_s15 }
 0x24a   : > { %v1027_v46 = vpop.xlane.xlu2 %1026 }
 0x24b   : > { %1665 = vrcp.f32 %v1027_v46 }
 0x24d   : > { %v1030_v48 = vpop.xlane.xlu0 %1029 }
 0x24e   : > { %1667 = vrcp.f32 %v1030_v48 }
 0x251   : > { %v1081_v33 = vpop.f32.mrf.mxu1  ;;  %v1666_v59 = vpop.eup %1665 }
 0x252   : > { %v1218_v6 = vmul.f32 %v1666_v59, %v1081_v33 }
 0x254   : > { %v1668_v61 = vpop.eup %1667  ;;  %v1226_v16 = vsel %vm410_vm0, %v1218_v6, 0.0 }
 0x255   : > { %v1036_v55 = vpop.xlane.xlu2 %1035 }
 0x256   : > { %v1033_v5 = vpop.xlane.xlu1 %1032 }
 0x257   : > { %1669 = vrcp.f32 %v1033_v5 }
 0x258   : > { %1671 = vrcp.f32 %v1036_v55 }
 0x259   : > { %v1083_v51 = vpop.f32.mrf.mxu1 }
 0x25a   : > { %v1100_v50 = vpop.f32.mrf.mxu2 }
 0x25b   : > { %v1219_v62 = vmul.f32 %v1668_v61, %v1100_v50 }
 0x25c   : > { %v1138_v56 = vpop.f32.mrf.mxu0 }
 0x25d   : > { %v1039_v58 = vpop.xlane.xlu0 %1038  ;;  %v1670_v0 = vpop.eup %1669  ;;  %v1227_v14 = vsel %vm410_vm0, %v1219_v62, 0.0 }
 0x25e   : > { %v1042_v1 = vpop.xlane.xlu1 %1041  ;;  %1673 = vrcp.f32 %v1039_v58  ;;  %v1672_v15 = vpop.eup %1671  ;;  %v1228_v35 = vadd.f32 %v1227_v14, %v1226_v16 }
 0x25f   : > { %1675 = vrcp.f32 %v1042_v1  ;;  %v1221_v36 = vmul.f32 %v1672_v15, %v1138_v56 }
 0x261   : > { %v1231_v20 = vsel %vm410_vm0, %v1221_v36, 0.0 }
 0x262   : > { %v1102_v63 = vpop.f32.mrf.mxu2  ;;  %v1045_v11 = vpop.xlane.xlu2 %1044 }
 0x263   : > { %v1119_v2 = vpop.f32.mrf.mxu3 }
 0x264   : > { %v1220_v7 = vmul.f32 %v1670_v0, %v1119_v2  ;;  %v1140_v8 = vpop.f32.mrf.mxu0  ;;  %v1157_v13 = vpop.f32.mrf.mxu1 }
 0x265   : > { %v1048_v18 = vpop.xlane.xlu0 %1047  ;;  %v1674_v43 = vpop.eup %1673 }
 0x266   : > { %v1229_v17 = vsel %vm410_vm0, %v1220_v7, 0.0  ;;  %1677 = vrcp.f32 %v1048_v18  ;;  %v1676_v19 = vpop.eup %1675  ;;  %v1222_v34 = vmul.f32 %v1674_v43, %v1157_v13 }
 0x267   : > { %v1230_v57 = vadd.f32 %v1229_v17, %v1228_v35  ;;  %1679 = vrcp.f32 %v1045_v11 }
 0x268   : > { %v1233_v52 = vsel %vm410_vm0, %v1222_v34, 0.0 }
 0x269   : > { %v1232_v23 = vadd.f32 %v1231_v20, %v1230_v57 }
 0x26a   : > { %v1176_v53 = vpop.f32.mrf.mxu2  ;;  %v908_v22 = vpop.permute.xlu2 %907 }
 0x26b   : > { %v1121_v3 = vpop.f32.mrf.mxu3  ;;  %v1223_v21 = vmul.f32 %v1676_v19, %v1176_v53  ;;  %v1234_v25 = vadd.f32 %v1233_v52, %v1232_v23 }
 0x26c   : > { %v1214_v47 = vpop.f32.mrf.mxu0  ;;  %v1159_v4 = vpop.f32.mrf.mxu1 }
 0x26d   : > { %v1678_v40 = vpop.eup %1677  ;;  %v1235_v60 = vsel %vm410_vm0, %v1223_v21, 0.0 }
 0x26e   : > { %v1680_v49 = vpop.eup %1679  ;;  %v1225_v27 = vmul.f32 %v1678_v40, %v1214_v47  ;;  %v1236_v9 = vadd.f32 %v1235_v60, %v1234_v25 }
 0x270   : > { %v1239_v37 = vsel %vm410_vm0, %v1225_v27, 0.0 }
 0x272   : > { %v1178_v24 = vpop.f32.mrf.mxu2  ;;  %v916_v38 = vpop.permute.xlu2 %915 }
 0x273   : > { %v1195_v26 = vpop.f32.mrf.mxu3 }
 0x274   : > { %v1224_v10 = vmul.f32 %v1680_v49, %v1195_v26  ;;  %v1216_v28 = vpop.f32.mrf.mxu0 }
 0x276   : > { %v1237_v29 = vsel %vm410_vm0, %v1224_v10, 0.0  ;;  %v904_v30 = vpop.permute.xlu1 %903 }
 0x277   : > { %v1238_v31 = vadd.f32 %v1237_v29, %v1236_v9  ;;  %v931_v32 = vsel %vm930_vm1, %v2245_v12, %v904_v30 }
 0x278   : > { %v912_v41 = vpop.permute.xlu0 %911  ;;  %v933_v42 = vsel %vm932_vm5, %v931_v32, %v908_v22 }
 0x279   : > { %v1240_v39 = vadd.f32 %v1239_v37, %v1238_v31  ;;  %v935_v46 = vsel %vm934_vm6, %v933_v42, %v912_v41 }
 0x27a   : > { %v936_v12 = vsel %vm410_vm0, %v935_v46, %v916_v38  ;;  %v928_v50 = vpop.permute.xlu2 %927 }
 0x27b   : > { %v1241_v44 = vpack.c.bf16 %v1240_v39, %v1240_v39  ;;  %v1197_v45 = vpop.f32.mrf.mxu3 }
 0x27d   : > { %1518 = vmatmul.msk.bf16.vlgmr.msrb.gmra.mxu1 %vm410_vm0, %v1241_v44 }
 0x27e   : > { %v920_v33 = vpop.permute.xlu1 %919 }
 0x27f   : > { %v938_v48 = vsel %vm937_vm7, %v936_v12, %v920_v33 }
 0x280   : > { %v924_v5 = vpop.permute.xlu0 %923 }
 0x281   : > { %v940_v51 = vsel %vm939_vm8, %v938_v48, %v924_v5 }
 0x282   : > { %v942_v54 = vsel %vm941_vm9, %v940_v51, %v928_v50 }
 0x283   : > { %944 = vst.msk [vmem:[%s399_s16] sm:$0xff] %vm943_vm10, %v942_v54 }
 0x284   : > { %1828 = shalt.err (!%p1825_p13)
}
 0x285   : > { %1544 = dma.vmem_to_hbm [thread:$0]  (%p2077_p4), %s1314_s20, 128, %s1316_s18, %s1285_s11   ;;  %v1648_v55 = vld [vmem:[%s2420_s4] ss:$0 sm:$0xff] }
 0x286   : > { %s1296_s19 = scalar_lea.hbm %s2423_s7, %s1521_s2  ;;  %s392_s0 = scalar_lea.vmem [#allocation12], %s2102_s1 }
 0x287   : > { %s1298_s26 = sshll.u32 %s392_s0, 4  ;;  %s1300_s23 = sshll.u32 %s1296_s19, 4  ;;  %s1299_s26 = int_to_ptr.vmem [resolvable:$true] %s1298_s26  ;;  %s1301_s23 = int_to_ptr.hbm [resolvable:$true] %s1300_s23 }
 0x288   : > { %s1280_s30 = scalar_lea.sflag [#allocation6], %s2099_s3  ;;  %s1843_s20 = sshra.s32 %s1301_s23, 4  ;;  %s1844_s20 = int_to_ptr.hbm [resolvable:$true] %s1843_s20 }
 0x289   : > { %s1845_s18 = scalar_lea.hbm %s1844_s20, 8  ;;  %s1849_s1 = scalar_lea.hbm %s2423_s7, 16 }
 0x28a   : > { %p1846_p0 = scmp.ne.s32.totalorder %s1844_s20, %s1845_s18  ;;  %p1850_p8 = scmp.lt.s32.totalorder %s1844_s20, %s2423_s7 }
 0x28b   : > { %p1851_p1 = scmp.lt.s32.totalorder %s1849_s1, %s1845_s18 }
 0x28c   : > { %p1847_p2 = pnand %p1846_p0, %p2077_p4 }
 0x28d   : > { %p1852_p3 = por %p1851_p1, %p1850_p8 }
 0x28e   : > { %p1848_p5 = pneg %p1847_p2 }
 0x290   : > { %p1853_p9 = pnand %p1852_p3, %p1848_p5 }
 0x2fa   : > { %v1274_v56 = vpop.f32.mrf.mxu1 }
 0x2fb   : > { %v1275_v58 = vadd.f32 %v1648_v55, %v1274_v56 }
 0x2fd   : > { %1278 = vst.msk [vmem:[%s392_s0] sm:$0xff] %vm410_vm0, %v1275_v58 }
 0x2fe   : > { %1856 = shalt.err (!%p1853_p9)
}
 0x2ff   : > { %1543 = dma.vmem_to_hbm [thread:$0]  (%p2077_p4), %s1299_s26, 128, %s1301_s23, %s1280_s30  }
 0x302   : > { %v1276_v59 = vpop.f32.mrf.mxu1 }
 0x303 PF: > { %s1327_s3 = sand.u32 1, %s1903_s27   ;;  %p1562_p10 = pnand %p1466_p6, %p2085_p7 }
 0x304   : > { %s1328_s16 = scalar_lea.sflag [#allocation6], %s1327_s3 }
 0x305   : > { %p1563_p11 = pneg %p1562_p10 }
 0x307   : > { %1894 = dma.done.wait (%p1563_p11), %s1328_s16, 128  }
 0x308   : > { %1896 = vsyncadd (%p1563_p11), %s1328_s16, 4294967168  ;;  %s1338_s22 = scalar_lea.sflag [#allocation14], %s1327_s3 }
 0x309   : > { %1898 = dma.done.wait (%p1563_p11), %s1338_s22, 128  }
 0x30a   : > { %1900 = vsyncadd (%p1563_p11), %s1338_s22, 4294967168  ;;  %s30_s10 = sadd.s32 1, %s1923_s10   ;;  %s2440_s27 = smov %s1907_s28 }
 0x30b   : > { %p27_p12 = scmp.ge.s32.totalorder %s30_s10, 4   ;;  %s2441_s28 = smov %s1911_s29 }
 0x30c   : > { %s2442_s29 = smov %s2083_s14  ;;  %s2443_s30 = smov %s1919_s9 }
 0x30d   : > { %s2444_s9 = smov %s2446_s24  ;;  %29 = sbr.rel (!%p27_p12) target bundleno = 15 (0xf), region = 127 }
 0x312   :  { %1344 = vsyncpa [#allocation5], 1 }
 0x313   :  { %1346 = vsyncpa [#allocation5 + $0x1], 1 }
 0x314   :  { %1347 = vsyncpa [#allocation8], 1 }
 0x315   :  { %1348 = vsyncpa [#allocation11], 1 }
 0x316   :  { %1349 = vsyncpa [#allocation6], 1 }
 0x317   :  { %1351 = vsyncpa [#allocation6 + $0x1], 1 }
 0x318   :  { %1352 = vsyncpa [#allocation14], 1 }
 0x319   :  { %1354 = vsyncpa [#allocation14 + $0x1], 1 }

</bundles_post_ra>
